<compile_context>
chip_gen: v7x
topology: tpu7x:2x2x1
jax: 0.10.0
libtpu: 0.0.40
codegen_flags: <defaults>
</compile_context>

<pallas_src>
import jax
import jax.numpy as jnp
from jax import lax
from jax.experimental import pallas as pl
from jax.experimental.pallas import tpu as pltpu

EPS = 1e-5            # RevIN eps (PyTorch default)
SEQ = 200             # sequence length / fc1 in-features
H = 100               # fc1/fc2 out-features, fc3 in-features
NOUT = 50             # fc3 out-features
PAD = 128             # lane-padded feature width

# packed-parameter slab layout (rows)
W1_OFF = 0                       # (200, 128)   fc1 weight (RevIN affine folded in)
W2_OFF = SEQ                     # (128, 128)   fc2 weight, padded
W3_OFF = SEQ + PAD               # (128, 128)   fc3 weight, padded
B_OFF = SEQ + 2 * PAD            # bias rows: b1 @ +0, b2 @ +8, b3 @ +16
SLAB_ROWS = B_OFF + 24           # 480 (multiple of 8)


def revin_net_kernel(x_ref, slab_ref, affine_ref, o_ref):
    x = x_ref[...]                                     # (tb, 200) f32
    ab = affine_ref[0]                                 # RevIN affine_bias
    inv_aw = affine_ref[1]                             # 1 / (affine_weight + eps^2), host-precomputed

    # ---- RevIN 'norm': two-pass per-row stats (no cancellation); the centered
    #      residual d is reused for the normalize so the second pass is free.
    inv_n = 1.0 / SEQ
    mean = jnp.sum(x, axis=-1, keepdims=True) * inv_n  # (tb, 1)
    d = x - mean
    var = jnp.sum(d * d, axis=-1, keepdims=True) * inv_n
    vpe = var + EPS
    inv_std = lax.rsqrt(vpe)                           # EUP rsqrt
    stdev = vpe * inv_std                              # == sqrt(var + eps)
    xn = d * inv_std                                   # affine folded into w1/b1

    # ---- packed, lane-padded parameters (VMEM-resident across grid steps) ----
    w1 = slab_ref[W1_OFF:W1_OFF + SEQ, :]              # (200, 128)
    w2 = slab_ref[W2_OFF:W2_OFF + PAD, :]              # (128, 128)
    w3 = slab_ref[W3_OFF:W3_OFF + PAD, :]              # (128, 128)
    b1 = slab_ref[B_OFF + 0:B_OFF + 1, :]              # (1, 128)
    b2 = slab_ref[B_OFF + 8:B_OFF + 9, :]              # (1, 128)
    b3 = slab_ref[B_OFF + 16:B_OFF + 17, :]            # (1, 128)

    # ---- encoder: fc1 -> relu -> fc2 -> relu ; then fc3 (padding lanes stay 0) ----
    h = jnp.maximum(jnp.dot(xn, w1, preferred_element_type=jnp.float32) + b1, 0.0)
    h = jnp.maximum(jnp.dot(h, w2, preferred_element_type=jnp.float32) + b2, 0.0)
    y = jnp.dot(h, w3, preferred_element_type=jnp.float32) + b3   # (tb, 128)

    # ---- RevIN 'denorm' folded into one scale/offset FMA:
    #   out = (y - ab)/(aw + eps^2) * stdev + mean = y*scale + (mean - ab*scale)
    scale = stdev * inv_aw                             # (tb, 1)
    o_ref[...] = (y * scale + (mean - ab * scale)).astype(o_ref.dtype)


def _round_up(n, m):
    return ((n + m - 1) // m) * m


def _choose_tile(batch, max_tile_b):
    """Batch tile: multiple of 8, as big as allowed (amortizes ~0.35us/step and
    fills MXU M on v6e/v7x), but split into >=2 grid steps when the batch is
    large enough (>=512 rows) so both v7x TensorCores get work."""
    b8 = _round_up(batch, 8)
    tb = min(_round_up(max(max_tile_b, 8), 8), b8)
    if pl.cdiv(batch, tb) == 1 and b8 >= 512:
        tb = _round_up(pl.cdiv(b8, 2), 8)              # two >=256-row tiles
    return tb


def pack_params(params):
    """Pack (w1,b1,w2,b2,w3,b3,rw,rb) -> (lane-dense slab (480,128), SMEM scalars (2,)).

    RevIN affine is folded into fc1:  (xn*aw + ab) @ w1 + b1
                                   == xn @ (aw*w1) + (b1 + ab*sum(w1, axis=0)).
    The denorm scalars travel as [affine_bias, 1/(affine_weight + eps^2)]."""
    w1, b1, w2, b2, w3, b3, rw, rb = params
    aw = rw[0].astype(jnp.float32)
    ab = rb[0].astype(jnp.float32)

    w1f = (w1.astype(jnp.float32) * aw)
    b1f = (b1.astype(jnp.float32) + ab * jnp.sum(w1.astype(jnp.float32), axis=0))

    def pad2(a, rows):
        out = jnp.zeros((rows, PAD), jnp.float32)
        return out.at[: a.shape[0], : a.shape[1]].set(a.astype(jnp.float32))

    bias = jnp.zeros((24, PAD), jnp.float32)
    bias = bias.at[0, : b1f.shape[0]].set(b1f)
    bias = bias.at[8, : b2.shape[0]].set(b2.astype(jnp.float32))
    bias = bias.at[16, : b3.shape[0]].set(b3.astype(jnp.float32))

    slab = jnp.concatenate(
        [pad2(w1f, SEQ), pad2(w2, PAD), pad2(w3, PAD), bias], axis=0
    )                                                   # (480, 128)
    affine = jnp.array([ab, 1.0 / (aw + EPS * EPS)], jnp.float32)   # -> SMEM
    return slab, affine


def revin_net_forward(x, packed, *, max_tile_b=1024, slice_output=True):
    """x: (200,) or (B, 200) -> (50,) or (B, 50); Revin_Net.forward applied
    independently per row (RevIN statistics are per sequence).

    slice_output=False returns the lane-padded (B, 128) kernel output (valid
    columns 0..49) so a downstream op can fuse the slice and skip one HBM copy."""
    slab, affine = packed
    squeeze = x.ndim == 1
    x2 = (x.reshape(1, SEQ) if squeeze else x).astype(jnp.float32)
    B = x2.shape[0]

    tb = _choose_tile(B, max_tile_b)
    grid = (pl.cdiv(B, tb),)          # partial last block: no wrapper-side jnp.pad;
                                      # garbage rows in the padded block are discarded.

    # Double-buffered x/out tiles + resident slab, with headroom for temps;
    # capped at 48 MiB to stay under v7x's 64 MiB physical VMEM.
    tile_bytes = 4 * (2 * tb * SEQ + 2 * tb * PAD + 2 * SLAB_ROWS * PAD)
    vmem_limit = int(min(48 << 20, max(32 << 20, 3 * tile_bytes)))

    out = pl.pallas_call(
        revin_net_kernel,
        out_shape=jax.ShapeDtypeStruct((B, PAD), jnp.float32),
        grid=grid,
        in_specs=[
            pl.BlockSpec((tb, SEQ), lambda i: (i, 0)),           # x row tile
            pl.BlockSpec((SLAB_ROWS, PAD), lambda i: (0, 0)),    # params: VMEM-resident
            pl.BlockSpec(memory_space=pltpu.MemorySpace.SMEM),   # RevIN denorm scalars
        ],
        out_specs=pl.BlockSpec((tb, PAD), lambda i: (i, 0)),
        compiler_params=pltpu.CompilerParams(
            dimension_semantics=("parallel",),   # v7x: 2 TCs split the batch grid
            vmem_limit_bytes=vmem_limit,
        ),
    )(x2, slab, affine)

    if not slice_output:
        return out                                   # (B, 128), cols >= NOUT are padding
    out = out[:, :NOUT]                              # separate XLA copy, not kernel cost
    return out.reshape(NOUT) if squeeze else out


def init_params(key):
    """Deterministic synthetic params. Linear weights stored as (in, out)."""
    ks = jax.random.split(key, 6)

    def linear(kw, kb, fan_in, fan_out):
        bound = 1.0 / jnp.sqrt(fan_in)
        w = jax.random.uniform(kw, (fan_in, fan_out), jnp.float32, -bound, bound)
        b = jax.random.uniform(kb, (fan_out,), jnp.float32, -bound, bound)
        return w, b

    w1, b1 = linear(ks[0], ks[1], SEQ, H)
    w2, b2 = linear(ks[2], ks[3], H, H)
    w3, b3 = linear(ks[4], ks[5], H, NOUT)
    rw = jnp.ones((1,), jnp.float32)                 # RevIN affine_weight
    rb = jnp.zeros((1,), jnp.float32)                # RevIN affine_bias
    return (w1, b1, w2, b2, w3, b3, rw, rb)


def reference_forward(x, params):
    """Pure-JAX reference mirroring the PyTorch module (single (200,) sequence)."""
    w1, b1, w2, b2, w3, b3, rw, rb = params
    mean = jnp.mean(x)
    stdev = jnp.sqrt(jnp.var(x) + EPS)
    xn = (x - mean) / stdev * rw[0] + rb[0]
    h = jnp.maximum(xn @ w1 + b1, 0.0)
    h = jnp.maximum(h @ w2 + b2, 0.0)
    y = h @ w3 + b3
    return (y - rb[0]) / (rw[0] + EPS * EPS) * stdev + mean


if __name__ == "__main__":
    key = jax.random.PRNGKey(0)
    kx, kb, kp = jax.random.split(key, 3)
    params = init_params(kp)
    packed = pack_params(params)

    # 1) exact module semantics: one (200,) sequence -> (50,)
    x1 = jax.random.normal(kx, (SEQ,), jnp.float32) * 3.0 + 1.5
    out1 = jax.block_until_ready(revin_net_forward(x1, packed))
    ref1 = reference_forward(x1, params)
    assert out1.shape == (NOUT,)
    assert jnp.allclose(out1, ref1, atol=2e-4, rtol=2e-4), (out1, ref1)

    # 2) small batch, tile=8 -> multi-step grid + partial last block
    #    (B=20 not a multiple of 8: exercises masked writeback, no wrapper pad)
    xb = jax.random.normal(kb, (20, SEQ), jnp.float32) * 2.0 - 0.5
    outb = jax.block_until_ready(revin_net_forward(xb, packed, max_tile_b=8))
    refb = jax.vmap(lambda r: reference_forward(r, params))(xb)
    assert outb.shape == (20, NOUT)
    assert jnp.allclose(outb, refb, atol=2e-4, rtol=2e-4), (outb, refb)

    # 3) non-default RevIN affine: exercises the fold-into-fc1 and the
    #    precomputed 1/(aw+eps^2) denorm path
    params3 = params[:6] + (jnp.full((1,), 0.8, jnp.float32),
                            jnp.full((1,), 0.25, jnp.float32))
    packed3 = pack_params(params3)
    out3 = jax.block_until_ready(revin_net_forward(xb, packed3))
    ref3 = jax.vmap(lambda r: reference_forward(r, params3))(xb)
    assert jnp.allclose(out3, ref3, atol=5e-4, rtol=5e-4), (out3, ref3)

    print("KERNEL_OK")
</pallas_src>

<mosaic_0001>
module attributes {stable_mosaic.version = 11 : i64} {
  func.func @revin_net_kernel(%arg0: i32, %arg1: memref<8x200xf32, #tpu.memory_space<vmem>>, %arg2: memref<480x128xf32, #tpu.memory_space<vmem>>, %arg3: memref<2xf32, #tpu.memory_space<smem>>, %arg4: memref<8x128xf32, #tpu.memory_space<vmem>>) attributes {dimension_semantics = [#tpu.dimension_semantics<parallel>], iteration_bounds = array<i64: 1>, scalar_prefetch = 0 : i64, scratch_operands = 0 : i64, tpu.core_type = #tpu.core_type<tc>, window_params = [{transform_indices = @transform_0, window_bounds = array<i64: 8, 200>}, {pipeline_mode = #tpu.pipeline_mode<synchronous>, transform_indices = @transform_1, window_bounds = array<i64: 480, 128>}, {transform_indices = @transform_2, window_bounds = array<i64: 2>}, {transform_indices = @transform_3, window_bounds = array<i64: 8, 128>}]} {
    %c0 = arith.constant 0 : index
    %c0_0 = arith.constant 0 : index
    %0 = vector.load %arg1[%c0, %c0_0] : memref<8x200xf32, #tpu.memory_space<vmem>>, vector<8x200xf32>
    %c0_1 = arith.constant 0 : index
    %1 = memref.load %arg3[%c0_1] : memref<2xf32, #tpu.memory_space<smem>>
    %c1 = arith.constant 1 : index
    %2 = memref.load %arg3[%c1] : memref<2xf32, #tpu.memory_space<smem>>
    %cst = arith.constant dense<0.000000e+00> : vector<8xf32>
    %3 = vector.multi_reduction <add>, %0, %cst [1] : vector<8x200xf32> to vector<8xf32>
    %4 = vector.shape_cast %3 : vector<8xf32> to vector<8x1xf32>
    %cst_2 = arith.constant 5.000000e-03 : f32
    %5 = vector.broadcast %cst_2 : f32 to vector<8x1xf32>
    %6 = arith.mulf %4, %5 : vector<8x1xf32>
    %7 = vector.broadcast %6 : vector<8x1xf32> to vector<8x200xf32>
    %8 = arith.subf %0, %7 : vector<8x200xf32>
    %9 = arith.mulf %8, %8 : vector<8x200xf32>
    %cst_3 = arith.constant dense<0.000000e+00> : vector<8xf32>
    %10 = vector.multi_reduction <add>, %9, %cst_3 [1] : vector<8x200xf32> to vector<8xf32>
    %11 = vector.shape_cast %10 : vector<8xf32> to vector<8x1xf32>
    %cst_4 = arith.constant 5.000000e-03 : f32
    %12 = vector.broadcast %cst_4 : f32 to vector<8x1xf32>
    %13 = arith.mulf %11, %12 : vector<8x1xf32>
    %cst_5 = arith.constant 9.99999974E-6 : f32
    %14 = vector.broadcast %cst_5 : f32 to vector<8x1xf32>
    %15 = arith.addf %13, %14 : vector<8x1xf32>
    %16 = math.rsqrt %15 : vector<8x1xf32>
    %17 = arith.mulf %15, %16 : vector<8x1xf32>
    %18 = vector.broadcast %16 : vector<8x1xf32> to vector<8x200xf32>
    %19 = arith.mulf %8, %18 : vector<8x200xf32>
    %c0_6 = arith.constant 0 : index
    %c0_7 = arith.constant 0 : index
    %20 = vector.load %arg2[%c0_6, %c0_7] : memref<480x128xf32, #tpu.memory_space<vmem>>, vector<200x128xf32>
    %c200 = arith.constant 200 : index
    %c0_8 = arith.constant 0 : index
    %21 = vector.load %arg2[%c200, %c0_8] : memref<480x128xf32, #tpu.memory_space<vmem>>, vector<128x128xf32>
    %c328 = arith.constant 328 : index
    %c0_9 = arith.constant 0 : index
    %22 = vector.load %arg2[%c328, %c0_9] : memref<480x128xf32, #tpu.memory_space<vmem>>, vector<128x128xf32>
    %c456 = arith.constant 456 : index
    %c0_10 = arith.constant 0 : index
    %23 = vector.load %arg2[%c456, %c0_10] : memref<480x128xf32, #tpu.memory_space<vmem>>, vector<1x128xf32>
    %c464 = arith.constant 464 : index
    %c0_11 = arith.constant 0 : index
    %24 = vector.load %arg2[%c464, %c0_11] : memref<480x128xf32, #tpu.memory_space<vmem>>, vector<1x128xf32>
    %c472 = arith.constant 472 : index
    %c0_12 = arith.constant 0 : index
    %25 = vector.load %arg2[%c472, %c0_12] : memref<480x128xf32, #tpu.memory_space<vmem>>, vector<1x128xf32>
    %cst_13 = arith.constant dense<0.000000e+00> : vector<8x128xf32>
    %26 = tpu.matmul %19, %20, %cst_13 {dimension_numbers = #tpu.dot_dimension_numbers<[1], [0], [0], [1], [0, 0, 1, 1], [], []>} : vector<8x200xf32>, vector<200x128xf32>, vector<8x128xf32> -> vector<8x128xf32>
    %27 = vector.broadcast %23 : vector<1x128xf32> to vector<8x128xf32>
    %28 = arith.addf %26, %27 : vector<8x128xf32>
    %cst_14 = arith.constant 0.000000e+00 : f32
    %29 = vector.broadcast %cst_14 : f32 to vector<8x128xf32>
    %30 = arith.maximumf %28, %29 : vector<8x128xf32>
    %cst_15 = arith.constant dense<0.000000e+00> : vector<8x128xf32>
    %31 = tpu.matmul %30, %21, %cst_15 {dimension_numbers = #tpu.dot_dimension_numbers<[1], [0], [0], [1], [0, 0, 1, 1], [], []>} : vector<8x128xf32>, vector<128x128xf32>, vector<8x128xf32> -> vector<8x128xf32>
    %32 = vector.broadcast %24 : vector<1x128xf32> to vector<8x128xf32>
    %33 = arith.addf %31, %32 : vector<8x128xf32>
    %cst_16 = arith.constant 0.000000e+00 : f32
    %34 = vector.broadcast %cst_16 : f32 to vector<8x128xf32>
    %35 = arith.maximumf %33, %34 : vector<8x128xf32>
    %cst_17 = arith.constant dense<0.000000e+00> : vector<8x128xf32>
    %36 = tpu.matmul %35, %22, %cst_17 {dimension_numbers = #tpu.dot_dimension_numbers<[1], [0], [0], [1], [0, 0, 1, 1], [], []>} : vector<8x128xf32>, vector<128x128xf32>, vector<8x128xf32> -> vector<8x128xf32>
    %37 = vector.broadcast %25 : vector<1x128xf32> to vector<8x128xf32>
    %38 = arith.addf %36, %37 : vector<8x128xf32>
    %39 = vector.broadcast %2 : f32 to vector<8x1xf32>
    %40 = arith.mulf %17, %39 : vector<8x1xf32>
    %41 = vector.broadcast %40 : vector<8x1xf32> to vector<8x128xf32>
    %42 = arith.mulf %38, %41 : vector<8x128xf32>
    %43 = vector.broadcast %1 : f32 to vector<8x1xf32>
    %44 = arith.mulf %43, %40 : vector<8x1xf32>
    %45 = arith.subf %6, %44 : vector<8x1xf32>
    %46 = vector.broadcast %45 : vector<8x1xf32> to vector<8x128xf32>
    %47 = arith.addf %42, %46 : vector<8x128xf32>
    %c0_18 = arith.constant 0 : index
    %c0_19 = arith.constant 0 : index
    %48 = vector.load %arg4[%c0_18, %c0_19] : memref<8x128xf32, #tpu.memory_space<vmem>>, vector<8x128xf32>
    tpu.vector_store %arg4[%c0_18, %c0_19], %47 {strides = array<i32>} : memref<8x128xf32, #tpu.memory_space<vmem>>, vector<8x128xf32>,
    return
  }
  func.func @transform_0(%arg0: i32) -> (i32, i32) {
    %c0_i32 = arith.constant 0 : i32
    %c0_i32_0 = arith.constant 0 : i32
    return %arg0, %c0_i32 : i32, i32
  }
  func.func @transform_1(%arg0: i32) -> (i32, i32) {
    %c0_i32 = arith.constant 0 : i32
    %c0_i32_0 = arith.constant 0 : i32
    %c0_i32_1 = arith.constant 0 : i32
    return %c0_i32, %c0_i32_0 : i32, i32
  }
  func.func @transform_2(%arg0: i32) -> i32 {
    %c0_i32 = arith.constant 0 : i32
    %c0_i32_0 = arith.constant 0 : i32
    return %c0_i32 : i32
  }
  func.func @transform_3(%arg0: i32) -> (i32, i32) {
    %c0_i32 = arith.constant 0 : i32
    %c0_i32_0 = arith.constant 0 : i32
    return %arg0, %c0_i32 : i32, i32
  }
}

</mosaic_0001>

<bundles_post_ra>
// kernel: tpu_custom_call.1
= control target key start
LH: loop header
LB: loop body
LE: loop exit
PB: predicated region body
PF: predicated region fallthrough
CT: control target
= control target key end

     0   :  { %8 = vsyncpa [#allocation3], 0  ;;  %s1283_s0 = inlined_call_operand.hbm [shape: f32[1,200], index: 0, kind: input, shape index: {}]   ;;  %s1284_s1 = inlined_call_operand.hbm [shape: f32[480,128], index: 1, kind: input, shape index: {}]   ;;  %s1285_s2 = inlined_call_operand.vmem [shape: f32[2], index: 2, kind: input, shape index: {}]   ;;  %s1286_s3 = inlined_call_operand.hbm [shape: f32[1,128], index: 3, kind: output, shape index: {}]  }
   0x1   :  { %9 = vsyncpa [#allocation7], 0 }
   0x2   :  { %10 = vsyncpa [#allocation5], 0 }
   0x3   :  { %11 = vsyncpa [#allocation4], 0 }
   0x4   :  { %16 = vsyncadd [#allocation3], 224  ;;  %s1021_s12 = smov [#allocation2]   ;;  %s935_s16 = scalar_lea.hbm %s1283_s0, 32 }
   0x5   :  { %s17_s13 = sshll.u32 %s1021_s12, 4  ;;  %p936_p0 = scmp.ne.s32.totalorder %s1283_s0, %s935_s16  ;;  %s18_s13 = int_to_ptr.vmem [resolvable:$true] %s17_s13 }
   0x6   :  { %p939_p1 = scmp.lt.u32.totalorder %s935_s16, %s1283_s0 }
   0x8   :  { %p941_p2 = pnand %p939_p1, %p936_p0 }
   0xa   :  { %944 = shalt.err (!%p941_p2)
}
   0xb   :  { %s945_s21 = scalar_lea.vmem %s18_s13, 32  ;;  %s949_s22 = scalar_lea.vmem %s18_s13, 256 }
   0xc   :  { %p946_p3 = scmp.ne.s32.totalorder %s18_s13, %s945_s21  ;;  %p950_p4 = scmp.lt.s32.totalorder %s18_s13, %s18_s13 }
   0xd   :  { %p951_p5 = scmp.lt.s32.totalorder %s949_s22, %s945_s21 }
   0xf   :  { %p952_p6 = por %p951_p5, %p950_p4 }
  0x11   :  { %p953_p7 = pnand %p952_p6, %p946_p3 }
  0x13   :  { %956 = shalt.err (!%p953_p7)
}
  0x14   :  { %s1022_s23 = smov 32   ;;  %s1023_s24 = smov 2  }
  0x15   :  { %23 = dma.hbm_to_vmem [thread:$0]  %s1283_s0, 32, %s18_s13, [#allocation3], %s1022_s23, %s1022_s23, %s1023_s24  }
  0x16   :  { %s1024_s27 = smov [#allocation6]   ;;  %s957_s4 = scalar_lea.hbm %s1284_s1, 7680 }
  0x17   :  { %s29_s28 = sshll.u32 %s1024_s27, 4  ;;  %p958_p8 = scmp.ne.s32.totalorder %s1284_s1, %s957_s4  ;;  %s30_s28 = int_to_ptr.vmem [resolvable:$true] %s29_s28 }
  0x18   :  { %p961_p9 = scmp.lt.u32.totalorder %s957_s4, %s1284_s1 }
  0x1a   :  { %p963_p10 = pnand %p961_p9, %p958_p8 }
  0x1c   :  { %966 = shalt.err (!%p963_p10)
}
  0x1d   :  { %s967_s9 = scalar_lea.vmem %s30_s28, 7680  ;;  %p972_p12 = scmp.lt.s32.totalorder %s30_s28, %s30_s28 }
  0x1e   :  { %p968_p11 = scmp.ne.s32.totalorder %s30_s28, %s967_s9  ;;  %p973_p13 = scmp.lt.s32.totalorder %s967_s9, %s967_s9 }
  0x20   :  { %p974_p0 = por %p973_p13, %p972_p12 }
  0x22   :  { %p975_p1 = pnand %p974_p0, %p968_p11 }
  0x24   :  { %978 = shalt.err (!%p975_p1)
}
  0x25   :  { %s1025_s0 = smov 128   ;;  %s1026_s10 = smov 8  }
  0x26   :  { %35 = dma.hbm_to_vmem [thread:$0]  %s1284_s1, 7680, %s30_s28, [#allocation7], %s1025_s0, %s1025_s0, %s1026_s10  }
  0x27   :  { %s42_s15 = sshll.u32 %s1285_s2, 4  ;;  %s43_s15 = int_to_ptr.vmem [resolvable:$true] %s42_s15 }
  0x28   :  { %s979_s16 = scalar_lea.vmem %s43_s15, 16  ;;  %p984_p3 = scmp.lt.s32.totalorder %s43_s15, %s43_s15 }
  0x29   :  { %p980_p2 = scmp.ne.s32.totalorder %s43_s15, %s979_s16  ;;  %p985_p4 = scmp.lt.s32.totalorder %s979_s16, %s979_s16 }
  0x2b   :  { %p986_p5 = por %p985_p4, %p984_p3 }
  0x2d   :  { %p987_p6 = pnand %p986_p5, %p980_p2 }
  0x2f   :  { %990 = shalt.err (!%p987_p6)
}
  0x30   :  { %s1027_s17 = smov [#allocation8]  }
  0x31   :  { %45 = dma.vmem_to_smem %s43_s15, 16, %s1027_s17, [#allocation5]  }
  0x32   :  { %1013 = dma.done.wait [#allocation3], 256  }
  0x33   :  { %1014 = vsyncadd [#allocation3], 4294967040 }
  0x34   :  { %1015 = dma.done.wait [#allocation7], 7680  }
  0x35   :  { %1016 = vsyncadd [#allocation7], 4294959616 }
  0x36   :  { %1017 = dma.done.wait [#allocation5], 16  }
  0x37   :  { %1018 = vsyncadd [#allocation5], 4294967280 }
  0x38   :  { %55 = sfence }
  0x39   :  { %v1082_v0 = vld [vmem:[#allocation2] sm:$0x3]  ;;  %v1084_v1 = vld [vmem:[#allocation2 + $0x2] sm:$0x3]  ;;  %v1086_v2 = vld [vmem:[#allocation2 + $0x4] sm:$0x3]  ;;  %v81_v3 = vlaneseq }
  0x3a   :  { %v1088_v4 = vld [vmem:[#allocation2 + $0x6] sm:$0x3]  ;;  %v1090_v5 = vld [vmem:[#allocation2 + $0x8] sm:$0x3]  ;;  %v1092_v6 = vld [vmem:[#allocation2 + $0xa] sm:$0x3]  ;;  %v74_v12 = vcombine.low %v1082_v0, %v1084_v1 }
  0x3b   :  { %v1094_v7 = vld [vmem:[#allocation2 + $0xc] sm:$0x3]  ;;  %v1096_v8 = vld [vmem:[#allocation2 + $0xe] sm:$0x3]  ;;  %v1028_v9 = vmov 1966171168   ;;  %v75_v13 = vcombine.low %v1086_v2, %v1088_v4  ;;  %v76_v14 = vcombine.low %v1090_v5, %v1092_v6 }
  0x3c   :  { %v79_v10 = vunpack.c.l.s4 %v1028_v9  ;;  %v1098_v11 = vshrl.u32 %v81_v3, 7  ;;  %v77_v15 = vcombine.low %v1094_v7, %v1096_v8  ;;  %vm142_vm0 = vcmask 588800   ;;  %v338_v34 = vld [vmem:[#allocation6] sm:$0xff]  ;;  %v339_v35 = vld [vmem:[#allocation6 + $0x8] sm:$0xff]  ;;  %v340_v36 = vld [vmem:[#allocation6 + $0x10] sm:$0xff]  ;;  %s726_s1 = sld [smem:[#allocation8 + $0x1]] }
  0x3d   :  { %v1029_v37 = vmov 0.0|0.0   ;;  %v836_v38 = vpack.c.bf16 %v339_v35, %v338_v34  ;;  %v341_v39 = vld [vmem:[#allocation6 + $0x18] sm:$0xff]  ;;  %v342_v41 = vld [vmem:[#allocation6 + $0x20] sm:$0xff]  ;;  %v343_v42 = vld [vmem:[#allocation6 + $0x28] sm:$0xff]  ;;  %vm1031_vm1 = vmmov 0   ;;  %s64_s2 = sld [smem:[#allocation8]] }
  0x3e   :  { %v80_v16 = vunpack.c.0.s8 %v79_v10  ;;  %835 = vmatprep.subr.bf16.mxu0 %v1029_v37  ;;  %871 = vmatprep.subr.bf16.mxu1 %v1029_v37  ;;  %v839_v40 = vpack.c.bf16 %v341_v39, %v340_v36  ;;  %v842_v43 = vpack.c.bf16 %v343_v42, %v342_v41  ;;  %v344_v44 = vld [vmem:[#allocation6 + $0x30] sm:$0xff]  ;;  %v345_v45 = vld [vmem:[#allocation6 + $0x38] sm:$0xff]  ;;  %v346_v47 = vld [vmem:[#allocation6 + $0x40] sm:$0xff]  ;;  %v151_v50 = vsub.s32 0, %v1098_v11 }
  0x3f   :  { %837 = vmatpush1.bf16.msra.mxu0 %v836_v38  ;;  %v845_v46 = vpack.c.bf16 %v345_v45, %v344_v44  ;;  %v347_v48 = vld [vmem:[#allocation6 + $0x48] sm:$0xff]  ;;  %v155_v51 = vsub.s32 1, %v1098_v11  ;;  %v159_v52 = vsub.s32 2, %v1098_v11  ;;  %v163_v53 = vsub.s32 3, %v1098_v11  ;;  %v349_v44 = vld [vmem:[#allocation6 + $0x58] sm:$0xff] }
  0x40   :  { %v1109_v17 = vsub.s32 %v80_v16, %v1098_v11  ;;  %838 = vmatprep.subr.bf16.mxu0 %v1029_v37  ;;  %v848_v49 = vpack.c.bf16 %v347_v48, %v346_v47  ;;  %v167_v55 = vsub.s32 4, %v1098_v11  ;;  %v171_v56 = vsub.s32 5, %v1098_v11  ;;  %v351_v47 = vld [vmem:[#allocation6 + $0x68] sm:$0xff] }
  0x41   :  { %v175_v57 = vsub.s32 6, %v1098_v11  ;;  %v179_v58 = vsub.s32 7, %v1098_v11 }
  0x42   :  { %v84_v18 = vrot.slane %v74_v12, %v1109_v17  ;;  %v91_v19 = vrot.slane %v75_v13, %v1109_v17  ;;  %v98_v20 = vrot.slane %v76_v14, %v1109_v17  ;;  %v105_v21 = vrot.slane %v77_v15, %v1109_v17 }
  0x43   :  { %840 = vmatpush1.bf16.msra.mxu0 %v839_v40 }
  0x44   :  { %v106_v22 = vcombine.low %v84_v18, %v91_v19  ;;  %v107_v23 = vcombine.high %v84_v18, %v91_v19  ;;  %v108_v24 = vcombine.low %v98_v20, %v105_v21  ;;  %v109_v25 = vcombine.high %v98_v20, %v105_v21  ;;  %841 = vmatprep.subr.bf16.mxu0 %v1029_v37 }
  0x46   :  { %v116_v26 = vrot.slane %v106_v22, %v1109_v17  ;;  %v123_v27 = vrot.slane %v107_v23, %v1109_v17  ;;  %v130_v28 = vrot.slane %v108_v24, %v1109_v17  ;;  %v137_v29 = vrot.slane %v109_v25, %v1109_v17 }
  0x47   :  { %843 = vmatpush1.bf16.msra.mxu0 %v842_v43  ;;  %v348_v43 = vld [vmem:[#allocation6 + $0x50] sm:$0xff] }
  0x48   :  { %v138_v30 = vcombine.low %v116_v26, %v130_v28  ;;  %v139_v31 = vcombine.low %v123_v27, %v137_v29  ;;  %844 = vmatprep.subr.bf16.mxu0 %v1029_v37  ;;  %v851_v45 = vpack.c.bf16 %v349_v44, %v348_v43 }
  0x4a   :  { %v143_v32 = vsel %vm142_vm0, %v139_v31, 0.0 }
  0x4b   :  { %v144_v33 = vadd.f32 %v143_v32, %v138_v30  ;;  %846 = vmatpush1.bf16.msra.mxu0 %v845_v46  ;;  %v350_v46 = vld [vmem:[#allocation6 + $0x60] sm:$0xff] }
  0x4c   :  { %847 = vmatprep.subr.bf16.mxu0 %v1029_v37  ;;  %v854_v48 = vpack.c.bf16 %v351_v47, %v350_v46 }
  0x4d   :  { %145 = vadd.xlane.f32.xlu0 %v144_v33 }
  0x4f   :  { %849 = vmatpush1.bf16.msra.mxu0 %v848_v49  ;;  %v352_v49 = vld [vmem:[#allocation6 + $0x70] sm:$0xff] }
  0x50   :  { %850 = vmatprep.subr.bf16.mxu0 %v1029_v37 }
  0x53   :  { %852 = vmatpush1.bf16.msra.mxu0 %v851_v45 }
  0x54   :  { %853 = vmatprep.subr.bf16.mxu0 %v1029_v37 }
  0x57   :  { %855 = vmatpush1.bf16.msra.mxu0 %v854_v48 }
  0x58   :  { %856 = vmatprep.subr.bf16.mxu0 %v1029_v37 }
  0xda   :  { %v146_v54 = vpop.xlane.xlu0 %145 }
  0xdb   :  { %v1135_v59 = vmul.f32 0.005, %v146_v54  ;;  %v353_v54 = vld [vmem:[#allocation6 + $0x78] sm:$0xff] }
  0xdd   :  { %v152_v60 = vrot.slane %v1135_v59, %v151_v50  ;;  %v156_v61 = vrot.slane %v1135_v59, %v155_v51  ;;  %v160_v62 = vrot.slane %v1135_v59, %v159_v52  ;;  %v164_v63 = vrot.slane %v1135_v59, %v163_v53 }
  0xde   :  { %v168_v3 = vrot.slane %v1135_v59, %v167_v55  ;;  %v172_v9 = vrot.slane %v1135_v59, %v171_v56  ;;  %v176_v10 = vrot.slane %v1135_v59, %v175_v57  ;;  %v180_v12 = vrot.slane %v1135_v59, %v179_v58 }
  0xdf   :  { %v1162_v13 = vsub.f32 %v1082_v0, %v152_v60  ;;  %v1165_v14 = vsub.f32 %v1084_v1, %v156_v61  ;;  %v1168_v15 = vsub.f32 %v1086_v2, %v160_v62  ;;  %v1171_v16 = vsub.f32 %v1088_v4, %v164_v63  ;;  %v354_v61 = vld [vmem:[#allocation6 + $0x80] sm:$0xff]  ;;  %v355_v62 = vld [vmem:[#allocation6 + $0x88] sm:$0xff] }
  0xe0   :  { %v1174_v18 = vsub.f32 %v1090_v5, %v168_v3  ;;  %v1177_v19 = vsub.f32 %v1092_v6, %v172_v9  ;;  %v1180_v20 = vsub.f32 %v1094_v7, %v176_v10  ;;  %v1183_v0 = vsub.f32 %v1096_v8, %v180_v12  ;;  %v356_v3 = vld [vmem:[#allocation6 + $0x90] sm:$0xff]  ;;  %v357_v9 = vld [vmem:[#allocation6 + $0x98] sm:$0xff]  ;;  %v358_v12 = vld [vmem:[#allocation6 + $0xa0] sm:$0xff] }
  0xe1   :  { %v197_v1 = vmul.f32 %v1162_v13, %v1162_v13  ;;  %v198_v2 = vmul.f32 %v1165_v14, %v1165_v14  ;;  %v199_v4 = vmul.f32 %v1168_v15, %v1168_v15  ;;  %v200_v5 = vmul.f32 %v1171_v16, %v1171_v16 }
  0xe2   :  { %v201_v6 = vmul.f32 %v1174_v18, %v1174_v18  ;;  %v202_v7 = vmul.f32 %v1177_v19, %v1177_v19  ;;  %v203_v8 = vmul.f32 %v1180_v20, %v1180_v20  ;;  %v204_v21 = vmul.f32 %v1183_v0, %v1183_v0 }
  0xe3   :  { %v213_v22 = vcombine.low %v197_v1, %v198_v2  ;;  %v214_v23 = vcombine.low %v199_v4, %v200_v5  ;;  %v857_v60 = vpack.c.bf16 %v353_v54, %v352_v49  ;;  %v860_v63 = vpack.c.bf16 %v355_v62, %v354_v61  ;;  %v359_v1 = vld [vmem:[#allocation6 + $0xa8] sm:$0xff]  ;;  %v360_v4 = vld [vmem:[#allocation6 + $0xb0] sm:$0xff]  ;;  %v361_v5 = vld [vmem:[#allocation6 + $0xb8] sm:$0xff] }
  0xe4   :  { %v215_v24 = vcombine.low %v201_v6, %v202_v7  ;;  %v216_v25 = vcombine.low %v203_v8, %v204_v21  ;;  %v863_v10 = vpack.c.bf16 %v357_v9, %v356_v3  ;;  %v866_v2 = vpack.c.bf16 %v359_v1, %v358_v12  ;;  %v362_v8 = vld [vmem:[#allocation6 + $0xc0] sm:$0xff]  ;;  %v363_v21 = vld [vmem:[#allocation6 + $0xc8] sm:$0xff] }
  0xe5   :  { %v223_v26 = vrot.slane %v213_v22, %v1109_v17  ;;  %v230_v27 = vrot.slane %v214_v23, %v1109_v17  ;;  %858 = vmatpush1.bf16.msra.mxu0 %v857_v60  ;;  %v869_v6 = vpack.c.bf16 %v361_v5, %v360_v4  ;;  %v1030_v7 = vmov 0.0   ;;  %v364_v22 = vld [vmem:[#allocation6 + $0xd0] sm:$0xff]  ;;  %v365_v23 = vld [vmem:[#allocation6 + $0xd8] sm:$0xff] }
  0xe6   :  { %v237_v28 = vrot.slane %v215_v24, %v1109_v17  ;;  %v244_v29 = vrot.slane %v216_v25, %v1109_v17  ;;  %859 = vmatprep.subr.bf16.mxu0 %v1029_v37  ;;  %v872_v24 = vpack.c.bf16 %v364_v22, %v363_v21  ;;  %v366_v25 = vld [vmem:[#allocation6 + $0xe0] sm:$0xff]  ;;  %v377_v21 = vld [vmem:[#allocation6 + $0x138] sm:$0xff]  ;;  %797 = vmatprep.mubr.msk.f32.mxu1 %vm1031_vm1, %v1030_v7 }
  0xe7   :  { %v245_v30 = vcombine.low %v223_v26, %v230_v27  ;;  %v246_v31 = vcombine.high %v223_v26, %v230_v27  ;;  %v875_v26 = vpack.c.bf16 %v366_v25, %v365_v23  ;;  %v367_v27 = vld [vmem:[#allocation6 + $0xe8] sm:$0xff]  ;;  %v378_v22 = vld [vmem:[#allocation6 + $0x140] sm:$0xff] }
  0xe8   :  { %v247_v32 = vcombine.low %v237_v28, %v244_v29  ;;  %v248_v33 = vcombine.high %v237_v28, %v244_v29  ;;  %873 = vmatpush3.bf16.msra.mxu1 %v872_v24  ;;  %v368_v28 = vld [vmem:[#allocation6 + $0xf0] sm:$0xff]  ;;  %v893_v23 = vpack.c.bf16 %v378_v22, %v377_v21  ;;  %v727_v24 = vld [vmem:[#allocation6 + $0x1c8] ss:$0 sm:$0xff] }
  0xe9   :  { %v255_v34 = vrot.slane %v245_v30, %v1109_v17  ;;  %v262_v35 = vrot.slane %v246_v31, %v1109_v17  ;;  %861 = vmatpush1.bf16.msra.mxu0 %v860_v63  ;;  %874 = vmatprep.subr.bf16.mxu1 %v1029_v37  ;;  %v878_v29 = vpack.c.bf16 %v368_v28, %v367_v27  ;;  %v369_v30 = vld [vmem:[#allocation6 + $0xf8] sm:$0xff]  ;;  %v370_v31 = vld [vmem:[#allocation6 + $0x100] sm:$0xff]  ;;  %v379_v25 = vld [vmem:[#allocation6 + $0x148] sm:$0xff] }
  0xea   :  { %v269_v36 = vrot.slane %v247_v32, %v1109_v17  ;;  %v276_v38 = vrot.slane %v248_v33, %v1109_v17  ;;  %862 = vmatprep.subr.bf16.mxu0 %v1029_v37  ;;  %v881_v32 = vpack.c.bf16 %v370_v31, %v369_v30  ;;  %v371_v33 = vld [vmem:[#allocation6 + $0x108] sm:$0xff]  ;;  %v381_v31 = vld [vmem:[#allocation6 + $0x158] sm:$0xff] }
  0xec   :  { %v277_v39 = vcombine.low %v255_v34, %v269_v36  ;;  %v278_v40 = vcombine.low %v262_v35, %v276_v38  ;;  %876 = vmatpush3.bf16.msra.mxu1 %v875_v26  ;;  %v372_v34 = vld [vmem:[#allocation6 + $0x110] sm:$0xff]  ;;  %v373_v36 = vld [vmem:[#allocation6 + $0x118] sm:$0xff]  ;;  %v374_v38 = vld [vmem:[#allocation6 + $0x120] sm:$0xff] }
  0xed   :  { %864 = vmatpush1.bf16.msra.mxu0 %v863_v10  ;;  %877 = vmatprep.subr.bf16.mxu1 %v1029_v37  ;;  %v884_v35 = vpack.c.bf16 %v372_v34, %v371_v33  ;;  %v380_v26 = vld [vmem:[#allocation6 + $0x150] sm:$0xff]  ;;  %v383_v34 = vld [vmem:[#allocation6 + $0x168] sm:$0xff] }
  0xee   :  { %v281_v41 = vsel %vm142_vm0, %v278_v40, 0.0  ;;  %865 = vmatprep.subr.bf16.mxu0 %v1029_v37  ;;  %v375_v40 = vld [vmem:[#allocation6 + $0x128] sm:$0xff] }
  0xef   :  { %v282_v42 = vadd.f32 %v281_v41, %v277_v39  ;;  %v887_v39 = vpack.c.bf16 %v374_v38, %v373_v36  ;;  %v376_v41 = vld [vmem:[#allocation6 + $0x130] sm:$0xff]  ;;  %v385_v38 = vld [vmem:[#allocation6 + $0x178] sm:$0xff] }
  0xf0   :  { %879 = vmatpush3.bf16.msra.mxu1 %v878_v29  ;;  %v896_v29 = vpack.c.bf16 %v380_v26, %v379_v25 }
  0xf1   :  { %283 = vadd.xlane.f32.xlu0 %v282_v42  ;;  %867 = vmatpush1.bf16.msra.mxu0 %v866_v2  ;;  %v890_v42 = vpack.c.bf16 %v376_v41, %v375_v40  ;;  %v387_v41 = vld [vmem:[#allocation6 + $0x188] sm:$0xff] }
  0xf2   :  { %868 = vmatprep.subr.bf16.mxu0 %v1029_v37  ;;  %880 = vmatprep.subr.bf16.mxu1 %v1029_v37 }
  0xf4   :  { %882 = vmatpush3.bf16.msra.mxu1 %v881_v32  ;;  %v382_v32 = vld [vmem:[#allocation6 + $0x160] sm:$0xff] }
  0xf5   :  { %870 = vmatpush1.bf16.msra.mxu0 %v869_v6  ;;  %883 = vmatprep.subr.bf16.mxu1 %v1029_v37  ;;  %v899_v33 = vpack.c.bf16 %v382_v32, %v381_v31 }
  0xf6   :  { %527 = vmatprep.subr.mxu0 %v1030_v7 }
  0xf8   :  { %885 = vmatpush3.bf16.msra.mxu1 %v884_v35  ;;  %v384_v35 = vld [vmem:[#allocation6 + $0x170] sm:$0xff] }
  0xf9   :  { %528 = vmatpush1.msra.mxu0 %v362_v8  ;;  %886 = vmatprep.subr.bf16.mxu1 %v1029_v37  ;;  %v902_v36 = vpack.c.bf16 %v384_v35, %v383_v34 }
  0xfc   :  { %888 = vmatpush3.bf16.msra.mxu1 %v887_v39  ;;  %v386_v39 = vld [vmem:[#allocation6 + $0x180] sm:$0xff] }
  0xfd   :  { %889 = vmatprep.subr.bf16.mxu1 %v1029_v37  ;;  %v905_v40 = vpack.c.bf16 %v386_v39, %v385_v38 }
 0x100   :  { %891 = vmatpush3.bf16.msra.mxu1 %v890_v42  ;;  %v388_v42 = vld [vmem:[#allocation6 + $0x190] sm:$0xff] }
 0x101   :  { %892 = vmatprep.subr.bf16.mxu1 %v1029_v37 }
 0x104   :  { %894 = vmatpush3.bf16.msra.mxu1 %v893_v23 }
 0x105   :  { %895 = vmatprep.subr.bf16.mxu1 %v1029_v37 }
 0x17e   :  { %v284_v43 = vpop.xlane.xlu0 %283 }
 0x17f   :  { %v285_v44 = vmul.f32 0.005, %v284_v43  ;;  %v908_v43 = vpack.c.bf16 %v388_v42, %v387_v41 }
 0x181   :  { %v286_v45 = vadd.f32 1e-05, %v285_v44  ;;  %v390_v44 = vld [vmem:[#allocation6 + $0x1a0] sm:$0xff] }
 0x183   :  { %933 = vrsqrt.f32 %v286_v45 }
 0x18d   :  { %v934_v46 = vpop.eup %933 }
 0x18e   :  { %v1224_v47 = vmul.f32 %v934_v46, %v286_v45  ;;  %v293_v48 = vrot.slane %v934_v46, %v151_v50  ;;  %v297_v49 = vrot.slane %v934_v46, %v155_v51  ;;  %v301_v54 = vrot.slane %v934_v46, %v159_v52 }
 0x18f   :  { %v305_v60 = vrot.slane %v934_v46, %v163_v53  ;;  %v309_v61 = vrot.slane %v934_v46, %v167_v55  ;;  %v313_v62 = vrot.slane %v934_v46, %v171_v56  ;;  %v317_v63 = vrot.slane %v934_v46, %v175_v57 }
 0x190   :  { %v321_v50 = vrot.slane %v934_v46, %v179_v58  ;;  %v330_v51 = vmul.f32 %v293_v48, %v1162_v13  ;;  %v331_v3 = vmul.f32 %v297_v49, %v1165_v14  ;;  %v332_v52 = vmul.f32 %v301_v54, %v1168_v15  ;;  %v391_v46 = vld [vmem:[#allocation6 + $0x1a8] sm:$0xff]  ;;  %v392_v48 = vld [vmem:[#allocation6 + $0x1b0] sm:$0xff]  ;;  %v393_v54 = vld [vmem:[#allocation6 + $0x1b8] sm:$0xff] }
 0x191   :  { %v333_v53 = vmul.f32 %v305_v60, %v1171_v16  ;;  %v334_v9 = vmul.f32 %v309_v61, %v1174_v18  ;;  %v335_v55 = vmul.f32 %v313_v62, %v1177_v19  ;;  %v336_v56 = vmul.f32 %v317_v63, %v1180_v20  ;;  %v394_v60 = vld [vmem:[#allocation6 + $0x1c0] sm:$0xff]  ;;  %v729_v62 = vld [vmem:[#allocation6 + $0x1d0] ss:$0 sm:$0xff] }
 0x192   :  { %v337_v10 = vmul.f32 %v321_v50, %v1183_v0  ;;  %v410_v57 = vcombine.low %v330_v51, %v331_v3  ;;  %v914_v49 = vpack.c.bf16 %v392_v48, %v391_v46  ;;  %v917_v61 = vpack.c.bf16 %v394_v60, %v393_v54 }
 0x193   :  { %v411_v12 = vcombine.low %v332_v52, %v333_v53  ;;  %v412_v11 = vcombine.low %v334_v9, %v335_v55  ;;  %v699_v52 = vstv %s726_s1  ;;  %v702_v9 = vstv %s64_s2  ;;  %v730_v55 = vld [vmem:[#allocation6 + $0x1d8] ss:$0 sm:$0xff] }
 0x194   :  { %v413_v58 = vcombine.low %v336_v56, %v337_v10  ;;  %v420_v13 = vrot.slane %v410_v57, %v1109_v17  ;;  %v700_v53 = vmul.f32 %v699_v52, %v1224_v47 }
 0x195   :  { %v427_v14 = vrot.slane %v411_v12, %v1109_v17  ;;  %v434_v15 = vrot.slane %v412_v11, %v1109_v17 }
 0x196   :  { %v441_v16 = vrot.slane %v413_v58, %v1109_v17  ;;  %v703_v56 = vmul.f32 %v702_v9, %v700_v53 }
 0x197   :  { %v443_v1 = vcombine.high %v420_v13, %v427_v14  ;;  %v442_v18 = vcombine.low %v420_v13, %v427_v14 }
 0x198   :  { %v445_v2 = vcombine.high %v434_v15, %v441_v16  ;;  %v444_v19 = vcombine.low %v434_v15, %v441_v16  ;;  %v704_v11 = vsub.f32 %v1135_v59, %v703_v56 }
 0x199   :  { %v459_v20 = vrot.slane %v443_v1, %v1109_v17  ;;  %v452_v0 = vrot.slane %v442_v18, %v1109_v17 }
 0x19a   :  { %v473_v4 = vrot.slane %v445_v2, %v1109_v17  ;;  %v466_v5 = vrot.slane %v444_v19, %v1109_v17 }
 0x19c   :  { %v475_v6 = vcombine.low %v459_v20, %v473_v4  ;;  %v474_v8 = vcombine.low %v452_v0, %v466_v5 }
 0x19e   :  { %728 = vmatprep.mubr.msk.f32.mxu0 %vm142_vm0, %v475_v6 }
 0x19f   :  { %544 = vmatmul.mubr.f32.vlgmr.msra.gmra.mrb[0].mxu0 %v474_v8 }
 0x272   :  { %v545_v27 = vpop.f32.mrb[0].mxu0 }
 0x273   :  { %v546_v28 = vadd.f32 %v727_v24, %v545_v27  ;;  %v547_v17 = vpop.f32.mrb[1].mxu0 }
 0x275   :  { %v549_v30 = vmax.f32 %v546_v28, 0.0 }
 0x277   :  { %798 = vmatmul.mubr.f32.vlgmr.msra.gmra.mrb[0].mxu1 %v549_v30 }
 0x278   :  { %897 = vmatpush3.bf16.msra.mxu1 %v896_v29  ;;  %832 = vmatprep.mubr.msk.f32.mxu1 %vm1031_vm1, %v1030_v7  ;;  %v389_v7 = vld [vmem:[#allocation6 + $0x198] sm:$0xff] }
 0x279   :  { %898 = vmatprep.subr.bf16.mxu1 %v1029_v37  ;;  %v911_v45 = vpack.c.bf16 %v390_v44, %v389_v7 }
 0x27c   :  { %900 = vmatpush3.bf16.msra.mxu1 %v899_v33 }
 0x27d   :  { %901 = vmatprep.subr.bf16.mxu1 %v1029_v37 }
 0x280   :  { %903 = vmatpush3.bf16.msra.mxu1 %v902_v36 }
 0x281   :  { %904 = vmatprep.subr.bf16.mxu1 %v1029_v37 }
 0x284   :  { %906 = vmatpush3.bf16.msra.mxu1 %v905_v40 }
 0x285   :  { %907 = vmatprep.subr.bf16.mxu1 %v1029_v37 }
 0x288   :  { %909 = vmatpush3.bf16.msra.mxu1 %v908_v43 }
 0x289   :  { %910 = vmatprep.subr.bf16.mxu1 %v1029_v37 }
 0x28c   :  { %912 = vmatpush3.bf16.msra.mxu1 %v911_v45 }
 0x28d   :  { %913 = vmatprep.subr.bf16.mxu1 %v1029_v37 }
 0x290   :  { %915 = vmatpush3.bf16.msra.mxu1 %v914_v49 }
 0x291   :  { %916 = vmatprep.subr.bf16.mxu1 %v1029_v37 }
 0x294   :  { %918 = vmatpush3.bf16.msra.mxu1 %v917_v61 }
 0x34a   :  { %v620_v63 = vpop.f32.mrb[0].mxu1 }
 0x34b   :  { %v621_v50 = vadd.f32 %v729_v62, %v620_v63  ;;  %v799_v51 = vpop.f32.mrb[1].mxu1 }
 0x34d   :  { %v624_v3 = vmax.f32 %v621_v50, 0.0 }
 0x34f   :  { %833 = vmatmul.mubr.f32.vlgmr.msra.gmra.mrb[2].mxu1 %v624_v3 }
 0x422   :  { %v695_v10 = vpop.f32.mrb[2].mxu1 }
 0x423   :  { %v696_v37 = vadd.f32 %v730_v55, %v695_v10  ;;  %v834_v57 = vpop.f32.mrb[3].mxu1 }
 0x425   :  { %v701_v12 = vmul.f32 %v700_v53, %v696_v37 }
 0x427   :  { %v705_v58 = vadd.f32 %v704_v11, %v701_v12 }
 0x429   :  { %706 = vst [vmem:[#allocation9] sm:$0xff] %v705_v58 }
 0x42a   :  { %711 = vsyncadd [#allocation4], 112  ;;  %s1032_s18 = smov [#allocation9]  }
 0x42b   :  { %s712_s19 = sshll.u32 %s1032_s18, 4  ;;  %s713_s19 = int_to_ptr.vmem [resolvable:$true] %s712_s19 }
 0x42c   :  { %s991_s20 = scalar_lea.vmem %s713_s19, 16  ;;  %s995_s21 = scalar_lea.vmem %s713_s19, 128 }
 0x42d   :  { %p992_p7 = scmp.ne.s32.totalorder %s713_s19, %s991_s20  ;;  %p996_p8 = scmp.lt.s32.totalorder %s713_s19, %s713_s19 }
 0x42e   :  { %p997_p9 = scmp.lt.s32.totalorder %s995_s21, %s991_s20 }
 0x430   :  { %p998_p10 = por %p997_p9, %p996_p8 }
 0x432   :  { %p999_p11 = pnand %p998_p10, %p992_p7 }
 0x434   :  { %1002 = shalt.err (!%p999_p11)
}
 0x435   :  { %s1003_s24 = scalar_lea.hbm %s1286_s3, 16 }
 0x436   :  { %p1004_p12 = scmp.ne.s32.totalorder %s1286_s3, %s1003_s24  ;;  %p1007_p13 = scmp.lt.u32.totalorder %s1003_s24, %s1286_s3 }
 0x438   :  { %p1009_p0 = pnand %p1007_p13, %p1004_p12 }
 0x43a   :  { %1012 = shalt.err (!%p1009_p0)
}
 0x43b   :  { %s1033_s29 = smov 16   ;;  %s1034_s30 = smov 1  }
 0x43c   :  { %718 = dma.vmem_to_hbm [thread:$0]  %s713_s19, 16, %s1286_s3, [#allocation4], %s1033_s29, %s1033_s29, %s1034_s30  }
 0x43d   :  { %1019 = dma.done.wait [#allocation4], 128  }
 0x43e   :  { %1020 = vsyncadd [#allocation4], 4294967168 }
 0x43f   :  { %722 = vsyncpa [#allocation3], 1 }
 0x440   :  { %723 = vsyncpa [#allocation7], 1 }
 0x441   :  { %724 = vsyncpa [#allocation4], 1 }
 0x442   :  { %725 = vsyncpa [#allocation5], 1 }

</bundles_post_ra>
